<compile_context>
chip_gen: v5e
topology: v5e:2x2
jax: 0.10.0
libtpu: 0.0.40
codegen_flags: <defaults>
</compile_context>

<pallas_src>
import math

import jax
import jax.numpy as jnp
from jax import lax
from jax.experimental import pallas as pl
from jax.experimental.pallas import tpu as pltpu


# ----------------------------------------------------------------------------
# Fused Pallas kernel for the whole ShortcutConnection
# ----------------------------------------------------------------------------
def shortcut_connection(x, params, kernel_sizes, *, down=False, down_sec=False):
    """Fused ShortcutConnection forward.

    x:            (N, H, W, Cin) float32, NHWC.
    params:       list of (w, b), w: (k, k, cin_i, cout) HWIO float32, b: (cout,).
    kernel_sizes: tuple of odd ints, one per conv layer.
    Returns (N, Ho, Wo, Cout) float32.
    """
    N, H, W, _ = x.shape
    n_layers = len(params)
    assert len(kernel_sizes) == n_layers
    for k in kernel_sizes:
        assert k % 2 == 1, "only odd kernel sizes (module uses 'same' padding)"

    strides = [2 if ((down and i == 0) or (down_sec and i == 1)) else 1
               for i in range(n_layers)]
    cins = [params[i][0].shape[2] for i in range(n_layers)]
    couts = [params[i][0].shape[3] for i in range(n_layers)]
    pads = [(k - 1) // 2 for k in kernel_sizes]

    hs, ws = [H], [W]
    for s in strides:
        assert hs[-1] % s == 0 and ws[-1] % s == 0
        hs.append(hs[-1] // s)
        ws.append(ws[-1] // s)
    Ho, Wo, Cout = hs[-1], ws[-1], couts[-1]

    # Flattened bf16 weights (k*k*cin, cout); row index = (kh*k + kw)*cin + c,
    # matching the lane order of the im2col slab built inside the kernel.
    w_flat = [params[i][0].reshape(kernel_sizes[i] ** 2 * cins[i], couts[i])
              .astype(jnp.bfloat16) for i in range(n_layers)]
    b_flat = [params[i][1].reshape(1, couts[i]).astype(jnp.float32)
              for i in range(n_layers)]

    p_max = max(pads)
    c_max = max(cins)
    pad_shape = (N, H + 2 * p_max, W + 2 * p_max, c_max)  # VMEM scratch (padded act)

    def kernel(*refs):
        # refs = (x, w0, b0, w1, b1, ..., out, pad_scratch)
        x_ref = refs[0]
        o_ref = refs[1 + 2 * n_layers]
        pad_ref = refs[2 + 2 * n_layers]

        act = x_ref[...].astype(jnp.float32)                     # (N, h, w, cin)
        acc = None
        for i in range(n_layers):
            w_ref = refs[1 + 2 * i]
            b_ref = refs[2 + 2 * i]
            k, p, s = kernel_sizes[i], pads[i], strides[i]
            cin, cout = cins[i], couts[i]
            h_in, w_in = hs[i], ws[i]
            h_out, w_out = hs[i + 1], ws[i + 1]

            # ---- zero-pad the activation into the VMEM scratch ----
            pad_ref[...] = jnp.zeros(pad_shape, jnp.float32)
            pad_ref[:, p:p + h_in, p:p + w_in, :cin] = act

            # ---- im2col: one (N*h_out*w_out, k*k*cin) slab ----
            patches = []
            for kh in range(k):
                for kw in range(k):
                    patch = pad_ref[:, kh:kh + h_in, kw:kw + w_in, :cin]
                    if s == 2:
                        # even rows: pure leading-dim regroup (layout no-op)
                        patch = patch.reshape(N, h_out, 2, w_in, cin)[:, :, 0]
                        # even cols: static sublane picks + restack
                        patch = jnp.stack(
                            [patch[:, :, 2 * j, :] for j in range(w_out)], axis=2)
                    patches.append(patch)
            slab = patches[0] if len(patches) == 1 else jnp.concatenate(patches, axis=-1)
            slab = slab.reshape(N * h_out * w_out, k * k * cin).astype(jnp.bfloat16)

            # ---- single MXU matmul per conv layer (bf16 x bf16 -> f32) ----
            acc = jnp.dot(slab, w_ref[...], preferred_element_type=jnp.float32)
            acc = acc + b_ref[...]
            if i < n_layers - 1:
                acc = jnp.maximum(acc, 0.0)                       # ReLU between convs
                act = acc.reshape(N, h_out, w_out, cout)

        o_ref[...] = acc                                          # (N*Ho*Wo, Cout)

    args = [x]
    for wf, bf in zip(w_flat, b_flat):
        args.append(wf)
        args.append(bf)

    out2d = pl.pallas_call(
        kernel,
        out_shape=jax.ShapeDtypeStruct((N * Ho * Wo, Cout), jnp.float32),
        scratch_shapes=[pltpu.VMEM(pad_shape, jnp.float32)],
    )(*args)
    return out2d.reshape(N, Ho, Wo, Cout)


# ----------------------------------------------------------------------------
# Pure-JAX reference (module semantics) for correctness checking
# ----------------------------------------------------------------------------
def shortcut_connection_ref(x, params, kernel_sizes, *, down=False, down_sec=False,
                            operand_dtype=jnp.float32):
    n = len(params)
    out = x
    for i, ((w, b), k) in enumerate(zip(params, kernel_sizes)):
        s = 2 if ((down and i == 0) or (down_sec and i == 1)) else 1
        p = (k - 1) // 2
        y = lax.conv_general_dilated(
            out.astype(operand_dtype), w.astype(operand_dtype),
            window_strides=(s, s), padding=((p, p), (p, p)),
            dimension_numbers=("NHWC", "HWIO", "NHWC"),
            preferred_element_type=jnp.float32,
            precision=lax.Precision.HIGHEST)
        y = y + b.astype(jnp.float32)
        if i < n - 1:
            y = jnp.maximum(y, 0.0)
        out = y
    return out


# ----------------------------------------------------------------------------
if __name__ == "__main__":
    key = jax.random.PRNGKey(0)
    N = 2

    # Configurations mirroring how TTFXFPN instantiates ShortcutConnection
    # (shortcut_cfg=(1,2,3) -> 1/2/3 convs of k=3, plus the down=True s8 branch),
    # plus one mixed-kernel / down_sec case to exercise the full module signature.
    #         name            cin cout kernel_sizes  down   down_sec  H   W
    configs = [
        ("shortcut_s16",      32, 32, (3,),          False, False,    4,  4),
        ("shortcut_s8",       16, 16, (3, 3),        False, False,    8,  8),
        ("shortcut_s4",        8,  8, (3, 3, 3),     False, False,   16, 16),
        ("shortcut_s8_down",   8, 16, (3, 3, 3),     True,  False,   16, 16),
        ("mixed_k_down_sec",   8, 16, (1, 3),        False, True,    16, 16),
    ]

    for name, cin, cout, ks, down, down_sec, H, W in configs:
        key, kx, *kp = jax.random.split(key, 2 + 2 * len(ks))
        x = jax.random.normal(kx, (N, H, W, cin), jnp.float32)

        params = []
        c_prev = cin
        for i, k in enumerate(ks):
            w = jax.random.normal(kp[2 * i], (k, k, c_prev, cout), jnp.float32)
            w = w / math.sqrt(k * k * c_prev)
            b = 0.05 * jax.random.normal(kp[2 * i + 1], (cout,), jnp.float32)
            params.append((w, b))
            c_prev = cout

        out = shortcut_connection(x, params, ks, down=down, down_sec=down_sec)
        out = jax.block_until_ready(out)

        s_all = 1
        for i in range(len(ks)):
            if (down and i == 0) or (down_sec and i == 1):
                s_all *= 2
        assert out.shape == (N, H // s_all, W // s_all, cout), (name, out.shape)

        # tight check: identical arithmetic (bf16 operands, f32 accumulation)
        ref_bf16 = shortcut_connection_ref(x, params, ks, down=down,
                                           down_sec=down_sec,
                                           operand_dtype=jnp.bfloat16)
        err = float(jnp.max(jnp.abs(out - ref_bf16)))
        assert jnp.allclose(out, ref_bf16, atol=2e-3, rtol=2e-3), (name, err)

        # sanity check against full-f32 module semantics (bf16 operand rounding only)
        ref_f32 = shortcut_connection_ref(x, params, ks, down=down,
                                          down_sec=down_sec,
                                          operand_dtype=jnp.float32)
        err32 = float(jnp.max(jnp.abs(out - ref_f32)))
        assert jnp.allclose(out, ref_f32, atol=5e-2, rtol=5e-2), (name, err32)

    print("KERNEL_OK")
</pallas_src>

<mosaic_0001>
module attributes {stable_mosaic.version = 11 : i64} {
  func.func @kernel(%arg0: memref<2x4x4x32xf32, #tpu.memory_space<vmem>>, %arg1: memref<288x32xbf16, #tpu.memory_space<vmem>>, %arg2: memref<1x32xf32, #tpu.memory_space<vmem>>, %arg3: memref<32x32xf32, #tpu.memory_space<vmem>>, %arg4: memref<2x6x6x32xf32, #tpu.memory_space<vmem>>) attributes {dimension_semantics = [], scalar_prefetch = 0 : i64, scratch_operands = 1 : i64, tpu.core_type = #tpu.core_type<tc>} {
    %c0 = arith.constant 0 : index
    %c0_0 = arith.constant 0 : index
    %c0_1 = arith.constant 0 : index
    %c0_2 = arith.constant 0 : index
    %0 = vector.load %arg0[%c0, %c0_0, %c0_1, %c0_2] : memref<2x4x4x32xf32, #tpu.memory_space<vmem>>, vector<2x4x4x32xf32>
    %cst = arith.constant 0.000000e+00 : f32
    %1 = vector.broadcast %cst : f32 to vector<2x6x6x32xf32>
    %c0_3 = arith.constant 0 : index
    %c0_4 = arith.constant 0 : index
    %c0_5 = arith.constant 0 : index
    %c0_6 = arith.constant 0 : index
    %2 = vector.load %arg4[%c0_3, %c0_4, %c0_5, %c0_6] : memref<2x6x6x32xf32, #tpu.memory_space<vmem>>, vector<2x6x6x32xf32>
    tpu.vector_store %arg4[%c0_3, %c0_4, %c0_5, %c0_6], %1 {strides = array<i32>} : memref<2x6x6x32xf32, #tpu.memory_space<vmem>>, vector<2x6x6x32xf32>,
    %c0_7 = arith.constant 0 : index
    %c1 = arith.constant 1 : index
    %c1_8 = arith.constant 1 : index
    %c0_9 = arith.constant 0 : index
    %3 = vector.load %arg4[%c0_7, %c1, %c1_8, %c0_9] : memref<2x6x6x32xf32, #tpu.memory_space<vmem>>, vector<2x4x4x32xf32>
    tpu.vector_store %arg4[%c0_7, %c1, %c1_8, %c0_9], %0 {strides = array<i32>} : memref<2x6x6x32xf32, #tpu.memory_space<vmem>>, vector<2x4x4x32xf32>,
    %c0_10 = arith.constant 0 : index
    %c0_11 = arith.constant 0 : index
    %c0_12 = arith.constant 0 : index
    %c0_13 = arith.constant 0 : index
    %4 = vector.load %arg4[%c0_10, %c0_11, %c0_12, %c0_13] : memref<2x6x6x32xf32, #tpu.memory_space<vmem>>, vector<2x4x4x32xf32>
    %c0_14 = arith.constant 0 : index
    %c0_15 = arith.constant 0 : index
    %c1_16 = arith.constant 1 : index
    %c0_17 = arith.constant 0 : index
    %5 = vector.load %arg4[%c0_14, %c0_15, %c1_16, %c0_17] : memref<2x6x6x32xf32, #tpu.memory_space<vmem>>, vector<2x4x4x32xf32>
    %c0_18 = arith.constant 0 : index
    %c0_19 = arith.constant 0 : index
    %c2 = arith.constant 2 : index
    %c0_20 = arith.constant 0 : index
    %6 = vector.load %arg4[%c0_18, %c0_19, %c2, %c0_20] : memref<2x6x6x32xf32, #tpu.memory_space<vmem>>, vector<2x4x4x32xf32>
    %c0_21 = arith.constant 0 : index
    %c1_22 = arith.constant 1 : index
    %c0_23 = arith.constant 0 : index
    %c0_24 = arith.constant 0 : index
    %7 = vector.load %arg4[%c0_21, %c1_22, %c0_23, %c0_24] : memref<2x6x6x32xf32, #tpu.memory_space<vmem>>, vector<2x4x4x32xf32>
    %c0_25 = arith.constant 0 : index
    %c1_26 = arith.constant 1 : index
    %c1_27 = arith.constant 1 : index
    %c0_28 = arith.constant 0 : index
    %8 = vector.load %arg4[%c0_25, %c1_26, %c1_27, %c0_28] : memref<2x6x6x32xf32, #tpu.memory_space<vmem>>, vector<2x4x4x32xf32>
    %c0_29 = arith.constant 0 : index
    %c1_30 = arith.constant 1 : index
    %c2_31 = arith.constant 2 : index
    %c0_32 = arith.constant 0 : index
    %9 = vector.load %arg4[%c0_29, %c1_30, %c2_31, %c0_32] : memref<2x6x6x32xf32, #tpu.memory_space<vmem>>, vector<2x4x4x32xf32>
    %c0_33 = arith.constant 0 : index
    %c2_34 = arith.constant 2 : index
    %c0_35 = arith.constant 0 : index
    %c0_36 = arith.constant 0 : index
    %10 = vector.load %arg4[%c0_33, %c2_34, %c0_35, %c0_36] : memref<2x6x6x32xf32, #tpu.memory_space<vmem>>, vector<2x4x4x32xf32>
    %c0_37 = arith.constant 0 : index
    %c2_38 = arith.constant 2 : index
    %c1_39 = arith.constant 1 : index
    %c0_40 = arith.constant 0 : index
    %11 = vector.load %arg4[%c0_37, %c2_38, %c1_39, %c0_40] : memref<2x6x6x32xf32, #tpu.memory_space<vmem>>, vector<2x4x4x32xf32>
    %c0_41 = arith.constant 0 : index
    %c2_42 = arith.constant 2 : index
    %c2_43 = arith.constant 2 : index
    %c0_44 = arith.constant 0 : index
    %12 = vector.load %arg4[%c0_41, %c2_42, %c2_43, %c0_44] : memref<2x6x6x32xf32, #tpu.memory_space<vmem>>, vector<2x4x4x32xf32>
    %13 = tpu.concatenate %4, %5, %6, %7, %8, %9, %10, %11, %12 in 3 : vector<2x4x4x32xf32>, vector<2x4x4x32xf32>, vector<2x4x4x32xf32>, vector<2x4x4x32xf32>, vector<2x4x4x32xf32>, vector<2x4x4x32xf32>, vector<2x4x4x32xf32>, vector<2x4x4x32xf32>, vector<2x4x4x32xf32> -> vector<2x4x4x288xf32>
    %14 = vector.shape_cast %13 : vector<2x4x4x288xf32> to vector<32x288xf32>
    %15 = arith.truncf %14 : vector<32x288xf32> to vector<32x288xbf16>
    %c0_45 = arith.constant 0 : index
    %c0_46 = arith.constant 0 : index
    %16 = vector.load %arg1[%c0_45, %c0_46] : memref<288x32xbf16, #tpu.memory_space<vmem>>, vector<288x32xbf16>
    %cst_47 = arith.constant dense<0.000000e+00> : vector<32x32xf32>
    %17 = tpu.matmul %15, %16, %cst_47 {dimension_numbers = #tpu.dot_dimension_numbers<[1], [0], [0], [1], [0, 0, 1, 1], [], []>} : vector<32x288xbf16>, vector<288x32xbf16>, vector<32x32xf32> -> vector<32x32xf32>
    %c0_48 = arith.constant 0 : index
    %c0_49 = arith.constant 0 : index
    %18 = vector.load %arg2[%c0_48, %c0_49] : memref<1x32xf32, #tpu.memory_space<vmem>>, vector<1x32xf32>
    %19 = vector.broadcast %18 : vector<1x32xf32> to vector<32x32xf32>
    %20 = arith.addf %17, %19 : vector<32x32xf32>
    %c0_50 = arith.constant 0 : index
    %c0_51 = arith.constant 0 : index
    %21 = vector.load %arg3[%c0_50, %c0_51] : memref<32x32xf32, #tpu.memory_space<vmem>>, vector<32x32xf32>
    tpu.vector_store %arg3[%c0_50, %c0_51], %20 {strides = array<i32>} : memref<32x32xf32, #tpu.memory_space<vmem>>, vector<32x32xf32>,
    return
  }
}

</mosaic_0001>

<bundles_post_ra>
// kernel: tpu_custom_call.1
= control target key start
LH: loop header
LB: loop body
LE: loop exit
PB: predicated region body
PF: predicated region fallthrough
CT: control target
= control target key end

     0   :  { %vm24_vm0 = vcmask 259072   ;;  %vm38_vm1 = vcmask 257024   ;;  %v824_v1 = vmov 0.0   ;;  %s1116_s0 = inlined_call_operand.vmem [shape: f32[2,4,4,32], index: 0, kind: input, shape index: {}]   ;;  %s1117_s1 = inlined_call_operand.vmem [shape: bf16[288,32], index: 1, kind: input, shape index: {}]   ;;  %s1118_s2 = inlined_call_operand.vmem [shape: f32[1,32], index: 2, kind: input, shape index: {}]   ;;  %s1119_s3 = inlined_call_operand.hbm [shape: f32[32,32], index: 3, kind: output, shape index: {}]  }
   0x1   :  { %v18_v0 = vld [vmem:[%s1116_s0 + $0x8] sm:$0xf]  ;;  %28 = vst.msk [vmem:[#allocation2 + $0x18] sm:$0x3f] %vm24_vm0, %v824_v1 }
   0x2   :  { %41 = vst.msk [vmem:[#allocation2 + $0x19] sm:$0xf] %vm38_vm1, %v18_v0 }
   0x3   :  { %25 = vst.msk [vmem:[#allocation2] sm:$0x3f] %vm24_vm0, %v824_v1 }
   0x4   :  { %8 = vsyncpa [#allocation4], 0  ;;  %26 = vst.msk [vmem:[#allocation2 + $0x8] sm:$0x3f] %vm24_vm0, %v824_v1  ;;  %s825_s14 = smov 32   ;;  %s826_s21 = smov 64  }
   0x5   :  { %27 = vst.msk [vmem:[#allocation2 + $0x10] sm:$0x3f] %vm24_vm0, %v824_v1  ;;  %v16_v3 = vld [vmem:[%s1116_s0] sm:$0xf]  ;;  %v19_v4 = vld [vmem:[%s1116_s0 + $0xc] sm:$0xf] }
   0x6   :  { %29 = vst.msk [vmem:[#allocation2 + $0x20] sm:$0x3f] %vm24_vm0, %v824_v1  ;;  %v17_v5 = vld [vmem:[%s1116_s0 + $0x4] sm:$0xf]  ;;  %v21_v18 = vld [vmem:[%s1116_s0 + $0x14] sm:$0xf] }
   0x7   :  { %30 = vst.msk [vmem:[#allocation2 + $0x28] sm:$0x3f] %vm24_vm0, %v824_v1  ;;  %v20_v19 = vld [vmem:[%s1116_s0 + $0x10] sm:$0xf]  ;;  %s827_s26 = smov 96   ;;  %v771_v62 = vld [vmem:[%s1117_s1 + $0x38] sm:$0xff] }
   0x8   :  { %31 = vst.msk [vmem:[#allocation2 + $0x30] sm:$0x3f] %vm24_vm0, %v824_v1  ;;  %v23_v23 = vld [vmem:[%s1116_s0 + $0x1c] sm:$0xf]  ;;  %v22_v24 = vld [vmem:[%s1116_s0 + $0x18] sm:$0xf]  ;;  %611 = vmatpush.bf16.msra.mxu0 %v771_v62  ;;  %782 = vmatpush.bf16.msra.mxu3 %v771_v62 }
   0x9   :  { %v89_v2 = vld [vmem:[#allocation2 + $0x1a] sm:$0xf]  ;;  %32 = vst.msk [vmem:[#allocation2 + $0x38] sm:$0x3f] %vm24_vm0, %v824_v1  ;;  %v779_v63 = vld [vmem:[%s1117_s1 + $0x78] sm:$0xff]  ;;  %vm312_vm2 = vcmask 261120  }
   0xa   :  { %228 = vrot.lane.b32.xlu1 %v89_v2, %s825_s14  ;;  %33 = vst.msk [vmem:[#allocation2 + $0x40] sm:$0x3f] %vm24_vm0, %v824_v1  ;;  %v97_v11 = vld [vmem:[#allocation2 + $0x18] sm:$0xf]  ;;  %v55_v14 = vld [vmem:[#allocation2 + $0x1] sm:$0xf]  ;;  %630 = vmatpush.bf16.msra.mxu1 %v779_v63 }
   0xb   :  { %34 = vst.msk [vmem:[#allocation2 + $0x48] sm:$0x3f] %vm24_vm0, %v824_v1  ;;  %v105_v16 = vld [vmem:[#allocation2 + $0x19] sm:$0xf]  ;;  %v63_v21 = vld [vmem:[#allocation2 + $0x2] sm:$0xf] }
   0xc   :  { %35 = vst.msk [vmem:[#allocation2 + $0x50] sm:$0x3f] %vm24_vm0, %v824_v1  ;;  %v58_v17 = vld [vmem:[#allocation2 + $0x19] sm:$0xf]  ;;  %vm321_vm3 = vcmask 523264   ;;  %vm330_vm4 = vcmask 785408  }
   0xd   :  { %36 = vst.msk [vmem:[#allocation2 + $0x58] sm:$0x3f] %vm24_vm0, %v824_v1  ;;  %v66_v26 = vld [vmem:[#allocation2 + $0x1a] sm:$0xf]  ;;  %vm395_vm5 = vcmask 1043456   ;;  %s678_s15 = sshll.u32 %s1119_s3, 4  ;;  %s679_s15 = int_to_ptr.hbm [resolvable:$true] %s678_s15 }
   0xe   :  { %39 = vst.msk [vmem:[#allocation2 + $0x9] sm:$0xf] %vm38_vm1, %v16_v3  ;;  %v99_v10 = vld [vmem:[#allocation2 + $0x28] sm:$0xf]  ;;  %v73_v29 = vld [vmem:[#allocation2 + $0x18] sm:$0xf] }
   0xf   :  { %42 = vst.msk [vmem:[#allocation2 + $0x21] sm:$0xf] %vm38_vm1, %v19_v4  ;;  %v107_v25 = vld [vmem:[#allocation2 + $0x29] sm:$0xf]  ;;  %v59_v42 = vld [vmem:[#allocation2 + $0x31] sm:$0xf] }
  0x10   :  { %40 = vst.msk [vmem:[#allocation2 + $0x11] sm:$0xf] %vm38_vm1, %v17_v5  ;;  %v67_v48 = vld [vmem:[#allocation2 + $0x32] sm:$0xf]  ;;  %v770_v3 = vld [vmem:[%s1117_s1 + $0x30] sm:$0xff]  ;;  %s829_s16 = smov 128  }
  0x11   :  { %44 = vst.msk [vmem:[#allocation2 + $0x41] sm:$0xf] %vm38_vm1, %v21_v18  ;;  %v778_v4 = vld [vmem:[%s1117_s1 + $0x70] sm:$0xff]  ;;  %612 = vmatpush.bf16.msra.mxu0 %v770_v3  ;;  %783 = vmatpush.bf16.msra.mxu3 %v770_v3  ;;  %s830_s17 = smov 8  }
  0x12   :  { %43 = vst.msk [vmem:[#allocation2 + $0x39] sm:$0xf] %vm38_vm1, %v20_v19  ;;  %631 = vmatpush.bf16.msra.mxu1 %v778_v4  ;;  %v774_v18 = vld [vmem:[%s1117_s1 + $0x50] sm:$0xff] }
  0x13   :  { %46 = vst.msk [vmem:[#allocation2 + $0x51] sm:$0xf] %vm38_vm1, %v23_v23 }
  0x14   :  { %45 = vst.msk [vmem:[#allocation2 + $0x49] sm:$0xf] %vm38_vm1, %v22_v24  ;;  %v103_v38 = vld [vmem:[#allocation2 + $0x58] sm:$0xf] }
  0x15   :  { %v87_v6 = vld [vmem:[#allocation2 + $0xa] sm:$0xf]  ;;  %v111_v51 = vld [vmem:[#allocation2 + $0x59] sm:$0xf] }
  0x16   :  { %224 = vrot.lane.b32.xlu0 %v87_v6, %s825_s14  ;;  %v90_v7 = vld [vmem:[#allocation2 + $0x22] sm:$0xf]  ;;  %v56_v15 = vld [vmem:[#allocation2 + $0x9] sm:$0xf] }
  0x17   :  { %230 = vrot.lane.b32.xlu1 %v90_v7, %s825_s14  ;;  %v96_v8 = vld [vmem:[#allocation2 + $0x10] sm:$0xf]  ;;  %v98_v12 = vld [vmem:[#allocation2 + $0x20] sm:$0xf]  ;;  %v64_v27 = vld [vmem:[#allocation2 + $0xa] sm:$0xf] }
  0x18   :  { %256 = vrot.lane.b32.xlu2 %v96_v8, %s826_s21  ;;  %v88_v9 = vld [vmem:[#allocation2 + $0x12] sm:$0xf]  ;;  %v106_v22 = vld [vmem:[#allocation2 + $0x21] sm:$0xf]  ;;  %v71_v30 = vld [vmem:[#allocation2 + $0x8] sm:$0xf] }
  0x19   :  { %v57_v13 = vld [vmem:[#allocation2 + $0x11] sm:$0xf]  ;;  %v92_v32 = vld [vmem:[#allocation2 + $0x42] sm:$0xf]  ;;  %v91_v34 = vld [vmem:[#allocation2 + $0x3a] sm:$0xf] }
  0x1a   :  { %v104_v20 = vld [vmem:[#allocation2 + $0x11] sm:$0xf]  ;;  %v74_v33 = vld [vmem:[#allocation2 + $0x20] sm:$0xf]  ;;  %v60_v43 = vld [vmem:[#allocation2 + $0x39] sm:$0xf] }
  0x1b   :  { %v65_v28 = vld [vmem:[#allocation2 + $0x12] sm:$0xf]  ;;  %v100_v35 = vld [vmem:[#allocation2 + $0x40] sm:$0xf]  ;;  %v93_v36 = vld [vmem:[#allocation2 + $0x4a] sm:$0xf] }
  0x1c   :  { %v72_v31 = vld [vmem:[#allocation2 + $0x10] sm:$0xf]  ;;  %v101_v39 = vld [vmem:[#allocation2 + $0x48] sm:$0xf]  ;;  %v61_v41 = vld [vmem:[#allocation2 + $0x41] sm:$0xf] }
  0x1d   :  { %v94_v37 = vld [vmem:[#allocation2 + $0x52] sm:$0xf]  ;;  %v109_v44 = vld [vmem:[#allocation2 + $0x49] sm:$0xf]  ;;  %v108_v47 = vld [vmem:[#allocation2 + $0x41] sm:$0xf] }
  0x1e   :  { %226 = vrot.lane.b32.xlu0 %v88_v9, %s825_s14  ;;  %v102_v40 = vld [vmem:[#allocation2 + $0x50] sm:$0xf]  ;;  %v62_v45 = vld [vmem:[#allocation2 + $0x49] sm:$0xf]  ;;  %v68_v53 = vld [vmem:[#allocation2 + $0x3a] sm:$0xf] }
  0x1f   :  { %262 = vrot.lane.b32.xlu1 %v99_v10, %s826_s21  ;;  %v110_v49 = vld [vmem:[#allocation2 + $0x51] sm:$0xf]  ;;  %v70_v52 = vld [vmem:[#allocation2 + $0x4a] sm:$0xf]  ;;  %v69_v56 = vld [vmem:[#allocation2 + $0x42] sm:$0xf] }
  0x20   :  { %258 = vrot.lane.b32.xlu2 %v97_v11, %s826_s21  ;;  %v77_v57 = vld [vmem:[#allocation2 + $0x48] sm:$0xf]  ;;  %v75_v58 = vld [vmem:[#allocation2 + $0x38] sm:$0xf]  ;;  %v76_v0 = vld [vmem:[#allocation2 + $0x40] sm:$0xf] }
  0x21   :  { %v78_v1 = vld [vmem:[#allocation2 + $0x50] sm:$0xf]  ;;  %v769_v7 = vld [vmem:[%s1117_s1 + $0x28] sm:$0xff]  ;;  %v768_v10 = vld [vmem:[%s1117_s1 + $0x20] sm:$0xff] }
  0x22   :  { %v777_v8 = vld [vmem:[%s1117_s1 + $0x68] sm:$0xff]  ;;  %613 = vmatpush.bf16.msra.mxu0 %v769_v7  ;;  %784 = vmatpush.bf16.msra.mxu3 %v769_v7  ;;  %v776_v11 = vld [vmem:[%s1117_s1 + $0x60] sm:$0xff]  ;;  %v112_v19 = vld [vmem:[#allocation2 + $0x12] sm:$0xf] }
  0x23   :  { %632 = vmatpush.bf16.msra.mxu1 %v777_v8  ;;  %v114_v23 = vld [vmem:[#allocation2 + $0x22] sm:$0xf]  ;;  %408 = vst [vmem:[#allocation1 + $0x10] ss:$2 sm:$0xff] %v112_v19  ;;  %v49_v8 = vld [vmem:[#allocation2 + $0x10] sm:$0xf] }
  0x24   :  { %416 = vst [vmem:[#allocation1 + $0x30] ss:$2 sm:$0xff] %v114_v23 }
  0x26   :  { %260 = vrot.lane.b32.xlu0 %v98_v12, %s826_s21  ;;  %614 = vmatpush.bf16.msra.mxu0 %v768_v10 }
  0x27   :  { %132 = vrot.lane.b32.xlu1 %v57_v13, %s825_s14  ;;  %633 = vmatpush.bf16.msra.mxu1 %v776_v11 }
  0x28   :  { %128 = vrot.lane.b32.xlu2 %v55_v14, %s825_s14  ;;  %v767_v14 = vld [vmem:[%s1117_s1 + $0x18] sm:$0xff]  ;;  %785 = vmatpush.bf16.msra.mxu3 %v768_v10 }
  0x2a   :  { %615 = vmatpush.bf16.msra.mxu0 %v767_v14 }
  0x2c   :  { %786 = vmatpush.bf16.msra.mxu3 %v767_v14 }
  0x2e   :  { %130 = vrot.lane.b32.xlu0 %v56_v15, %s825_s14  ;;  %v775_v15 = vld [vmem:[%s1117_s1 + $0x58] sm:$0xff] }
  0x2f   :  { %290 = vrot.lane.b32.xlu1 %v105_v16, %s827_s26  ;;  %634 = vmatpush.bf16.msra.mxu1 %v775_v15 }
  0x30   :  { %134 = vrot.lane.b32.xlu2 %v58_v17, %s825_s14  ;;  %v766_v17 = vld [vmem:[%s1117_s1 + $0x10] sm:$0xff] }
  0x31   :  { %616 = vmatpush.bf16.msra.mxu0 %v766_v17  ;;  %787 = vmatpush.bf16.msra.mxu3 %v766_v17 }
  0x33   :  { %635 = vmatpush.bf16.msra.mxu1 %v774_v18  ;;  %v48_v18 = vld [vmem:[#allocation2 + $0x8] sm:$0xf] }
  0x36   :  { %288 = vrot.lane.b32.xlu0 %v104_v20, %s827_s26  ;;  %v79_v20 = vld [vmem:[#allocation2 + $0x9] sm:$0xf] }
  0x37   :  { %160 = vrot.lane.b32.xlu1 %v63_v21, %s826_s21 }
  0x38   :  { %292 = vrot.lane.b32.xlu2 %v106_v22, %s827_s26  ;;  %v113_v22 = vld [vmem:[#allocation2 + $0x1a] sm:$0xf] }
  0x39   :  { %410 = vst [vmem:[#allocation1 + $0x11] ss:$2 sm:$0xff] %v113_v22 }
  0x3e   :  { %294 = vrot.lane.b32.xlu0 %v107_v25, %s827_s26  ;;  %v781_v25 = vld [vmem:[%s1117_s1 + $0x88] sm:$0xff] }
  0x3f   :  { %166 = vrot.lane.b32.xlu1 %v66_v26, %s826_s21  ;;  %v115_v26 = vld [vmem:[#allocation2 + $0x2a] sm:$0xf]  ;;  %655 = vmatpush.bf16.msra.mxu2 %v781_v25 }
  0x40   :  { %162 = vrot.lane.b32.xlu2 %v64_v27, %s826_s21  ;;  %v765_v27 = vld [vmem:[%s1117_s1 + $0x8] sm:$0xff]  ;;  %418 = vst [vmem:[#allocation1 + $0x31] ss:$2 sm:$0xff] %v115_v26 }
  0x41   :  { %617 = vmatpush.bf16.msra.mxu0 %v765_v27  ;;  %788 = vmatpush.bf16.msra.mxu3 %v765_v27 }
  0x46   :  { %164 = vrot.lane.b32.xlu0 %v65_v28, %s826_s21  ;;  %v773_v28 = vld [vmem:[%s1117_s1 + $0x48] sm:$0xff] }
  0x47   :  { %196 = vrot.lane.b32.xlu1 %v73_v29, %s827_s26  ;;  %v780_v29 = vld [vmem:[%s1117_s1 + $0x80] sm:$0xff]  ;;  %636 = vmatpush.bf16.msra.mxu1 %v773_v28 }
  0x48   :  { %192 = vrot.lane.b32.xlu2 %v71_v30, %s827_s26  ;;  %656 = vmatpush.bf16.msra.mxu2 %v780_v29 }
  0x4e   :  { %194 = vrot.lane.b32.xlu0 %v72_v31, %s827_s26  ;;  %v47_v31 = vld [vmem:[#allocation2] sm:$0xf] }
  0x4f   :  { %234 = vrot.lane.b32.xlu1 %v92_v32, %s825_s14 }
  0x50   :  { %198 = vrot.lane.b32.xlu2 %v74_v33, %s827_s26 }
  0x56   :  { %232 = vrot.lane.b32.xlu0 %v91_v34, %s825_s14  ;;  %v764_v34 = vld [vmem:[%s1117_s1] sm:$0xff] }
  0x57   :  { %264 = vrot.lane.b32.xlu1 %v100_v35, %s826_s21  ;;  %v772_v35 = vld [vmem:[%s1117_s1 + $0x40] sm:$0xff]  ;;  %618 = vmatpush.bf16.msra.mxu0 %v764_v34 }
  0x58   :  { %236 = vrot.lane.b32.xlu2 %v93_v36, %s825_s14  ;;  %637 = vmatpush.bf16.msra.mxu1 %v772_v35 }
  0x59   :  { %789 = vmatpush.bf16.msra.mxu3 %v764_v34 }
  0x5e   :  { %238 = vrot.lane.b32.xlu0 %v94_v37, %s825_s14 }
  0x5f   :  { %270 = vrot.lane.b32.xlu1 %v103_v38, %s826_s21 }
  0x60   :  { %266 = vrot.lane.b32.xlu2 %v101_v39, %s826_s21  ;;  %v116_v39 = vld [vmem:[#allocation2 + $0x42] sm:$0xf] }
  0x66   :  { %268 = vrot.lane.b32.xlu0 %v102_v40, %s826_s21  ;;  %v82_v40 = vld [vmem:[#allocation2 + $0x21] sm:$0xf] }
  0x67   :  { %140 = vrot.lane.b32.xlu1 %v61_v41, %s825_s14 }
  0x68   :  { %136 = vrot.lane.b32.xlu2 %v59_v42, %s825_s14 }
  0x6e   :  { %138 = vrot.lane.b32.xlu0 %v60_v43, %s825_s14 }
  0x6f   :  { %298 = vrot.lane.b32.xlu1 %v109_v44, %s827_s26  ;;  %v117_v44 = vld [vmem:[#allocation2 + $0x4a] sm:$0xf] }
  0x70   :  { %142 = vrot.lane.b32.xlu2 %v62_v45, %s825_s14 }
  0x72   :  { %v932_v46 = vpop.permute.xlu2 %256 }
  0x76   :  { %296 = vrot.lane.b32.xlu0 %v108_v47, %s827_s26  ;;  %v421_v47 = vld.sshfl [vmem:[#allocation1 + $0x10] sm:$0xff pattern:$0x75316420] }
  0x77   :  { %168 = vrot.lane.b32.xlu1 %v67_v48, %s826_s21  ;;  %427 = vst [vmem:[#allocation1 + $0x10] ss:$2 sm:$0xff] %v116_v39 }
  0x78   :  { %300 = vrot.lane.b32.xlu2 %v110_v49, %s827_s26  ;;  %v424_v49 = vld.sshfl [vmem:[#allocation1 + $0x30] sm:$0xff pattern:$0x75316420]  ;;  %428 = vst [vmem:[#allocation1 + $0x11] ss:$2 sm:$0xff] %v117_v44 }
  0x79   :  { %v83_v44 = vld [vmem:[#allocation2 + $0x39] sm:$0xf] }
  0x7a   :  { %v937_v50 = vpop.permute.xlu2 %258 }
  0x7c   :  { %v941_v54 = vpop.permute.xlu1 %228 }
  0x7e   :  { %302 = vrot.lane.b32.xlu0 %v111_v51, %s827_s26  ;;  %v119_v51 = vld [vmem:[#allocation2 + $0x5a] sm:$0xf] }
  0x7f   :  { %174 = vrot.lane.b32.xlu1 %v70_v52, %s826_s21  ;;  %v453_v52 = vpack.c.bf16 %v424_v49, %v421_v47  ;;  %432 = vst [vmem:[#allocation1 + $0x31] ss:$2 sm:$0xff] %v119_v51  ;;  %v51_v47 = vld [vmem:[#allocation2 + $0x30] sm:$0xf] }
  0x80   :  { %170 = vrot.lane.b32.xlu2 %v68_v53, %s826_s21  ;;  %v50_v53 = vld [vmem:[#allocation2 + $0x18] sm:$0xf] }
  0x81   :  { %762 = vmatmul.msk.bf16.vlgmr.msra.gmra.mxu2 %vm312_vm2, %v453_v52 }
  0x82   :  { %v944_v55 = vpop.permute.xlu2 %128 }
  0x83   :  { %v313_v36 = vsel %vm312_vm2, %v47_v31, %v944_v55  ;;  %v81_v55 = vld [vmem:[#allocation2 + $0x19] sm:$0xf] }
  0x86   :  { %172 = vrot.lane.b32.xlu0 %v69_v56, %s826_s21 }
  0x87   :  { %204 = vrot.lane.b32.xlu1 %v77_v57, %s827_s26 }
  0x88   :  { %v225_v59 = vpop.permute.xlu0 %224  ;;  %200 = vrot.lane.b32.xlu2 %v75_v58, %s827_s26 }
  0x89   :  { %v949_v60 = vpop.permute.xlu1 %230  ;;  %v339_v30 = vsel %vm312_vm2, %v79_v20, %v225_v59 }
  0x8a   :  { %v951_v61 = vpop.permute.xlu2 %134  ;;  %v347_v32 = vsel %vm321_vm3, %v339_v30, %v932_v46  ;;  %v118_v46 = vld [vmem:[#allocation2 + $0x52] sm:$0xf]  ;;  %v342_v56 = vsel %vm312_vm2, %v82_v40, %v949_v60 }
  0x8b   :  { %431 = vst [vmem:[#allocation1 + $0x30] ss:$2 sm:$0xff] %v118_v46  ;;  %v316_v59 = vsel %vm312_vm2, %v50_v53, %v951_v61  ;;  %v80_v61 = vld [vmem:[#allocation2 + $0x11] sm:$0xf] }
  0x8e   :  { %202 = vrot.lane.b32.xlu0 %v76_v0, %s827_s26  ;;  %v341_v0 = vsel %vm312_vm2, %v81_v55, %v941_v54 }
  0x90   :  { %v960_v2 = vpop.permute.xlu0 %226  ;;  %206 = vrot.lane.b32.xlu2 %v78_v1, %s827_s26 }
  0x91   :  { %v969_v5 = vpop.permute.xlu1 %262  ;;  %v340_v14 = vsel %vm312_vm2, %v80_v61, %v960_v2 }
  0x92   :  { %v971_v6 = vpop.permute.xlu2 %292  ;;  %v350_v57 = vsel %vm321_vm3, %v342_v56, %v969_v5 }
  0x98   :  { %v979_v9 = vpop.permute.xlu0 %260 }
  0x99   :  { %v987_v12 = vpop.permute.xlu1 %132  ;;  %v349_v4 = vsel %vm321_vm3, %v341_v0, %v979_v9  ;;  %v54_v0 = vld [vmem:[#allocation2 + $0x48] sm:$0xf] }
  0x9a   :  { %v989_v13 = vpop.permute.xlu2 %162  ;;  %v357_v10 = vsel %vm330_vm4, %v349_v4, %v971_v6  ;;  %v315_v54 = vsel %vm312_vm2, %v49_v8, %v987_v12  ;;  %v348_v6 = vsel %vm321_vm3, %v340_v14, %v937_v50 }
  0x9b   :  { %v389_v15 = vrot.slane %v357_v10, 4 }
  0xa0   :  { %v997_v16 = vpop.permute.xlu0 %130 }
  0xa1   :  { %v1005_v21 = vpop.permute.xlu1 %290  ;;  %v314_v12 = vsel %vm312_vm2, %v48_v18, %v997_v16  ;;  %v53_v18 = vld [vmem:[#allocation2 + $0x40] sm:$0xf] }
  0xa2   :  { %v193_v24 = vpop.permute.xlu2 %192  ;;  %v356_v2 = vsel %vm330_vm4, %v348_v6, %v1005_v21  ;;  %v323_v23 = vsel %vm321_vm3, %v314_v12, %v989_v13 }
  0xa8   :  { %v289_v33 = vpop.permute.xlu0 %288 }
  0xa9   :  { %v355_v37 = vsel %vm330_vm4, %v347_v32, %v289_v33  ;;  %v161_v38 = vpop.permute.xlu1 %160 }
  0xaa   :  { %v387_v41 = vrot.slane %v355_v37, 4  ;;  %v322_v42 = vsel %vm321_vm3, %v313_v36, %v161_v38  ;;  %v199_v43 = vpop.permute.xlu2 %198 }
  0xab   :  { %v331_v45 = vsel %vm330_vm4, %v322_v42, %v193_v24  ;;  %v388_v24 = vrot.slane %v356_v2, 4 }
  0xac   :  { %v396_v48 = vsel %vm395_vm5, %v331_v45, %v387_v41  ;;  %v438_v45 = vld.sshfl [vmem:[#allocation1 + $0x30] sm:$0xff pattern:$0x75316420] }
  0xad   :  { %404 = vst [vmem:[#allocation1] ss:$2 sm:$0xff] %v396_v48 }
  0xb0   :  { %v295_v58 = vpop.permute.xlu0 %294 }
  0xb1   :  { %v358_v62 = vsel %vm330_vm4, %v350_v57, %v295_v58  ;;  %v167_v63 = vpop.permute.xlu1 %166 }
  0xb2   :  { %v390_v1 = vrot.slane %v358_v62, 4  ;;  %v325_v60 = vsel %vm321_vm3, %v316_v59, %v167_v63  ;;  %v1045_v3 = vpop.permute.xlu2 %236  ;;  %v86_v62 = vld [vmem:[#allocation2 + $0x51] sm:$0xf] }
  0xb3   :  { %v334_v5 = vsel %vm330_vm4, %v325_v60, %v199_v43  ;;  %v435_v43 = vld.sshfl [vmem:[#allocation1 + $0x10] sm:$0xff pattern:$0x75316420] }
  0xb4   :  { %v399_v7 = vsel %vm395_vm5, %v334_v5, %v390_v1  ;;  %v456_v46 = vpack.c.bf16 %v438_v45, %v435_v43  ;;  %v85_v1 = vld [vmem:[#allocation2 + $0x49] sm:$0xf] }
  0xb5   :  { %414 = vst [vmem:[#allocation1 + $0x21] ss:$2 sm:$0xff] %v399_v7 }
  0xb6   :  { %763 = vmatmul.msk.bf16.gmra.mxu2 %vm312_vm2, %v456_v46 }
  0xb8   :  { %v165_v11 = vpop.permute.xlu0 %164 }
  0xb9   :  { %v324_v9 = vsel %vm321_vm3, %v315_v54, %v165_v11  ;;  %v197_v17 = vpop.permute.xlu1 %196  ;;  %v345_v54 = vsel %vm312_vm2, %v85_v1, %v1045_v3 }
  0xba   :  { %v333_v19 = vsel %vm330_vm4, %v324_v9, %v197_v17  ;;  %v1059_v20 = vpop.permute.xlu2 %266 }
  0xbb   :  { %v398_v22 = vsel %vm395_vm5, %v333_v19, %v389_v15  ;;  %v84_v19 = vld [vmem:[#allocation2 + $0x41] sm:$0xf] }
  0xbc   :  { %412 = vst [vmem:[#allocation1 + $0x20] ss:$2 sm:$0xff] %v398_v22 }
  0xc0   :  { %v195_v25 = vpop.permute.xlu0 %194 }
  0xc1   :  { %v332_v26 = vsel %vm330_vm4, %v323_v23, %v195_v25  ;;  %v1071_v27 = vpop.permute.xlu1 %234  ;;  %v52_v25 = vld [vmem:[#allocation2 + $0x38] sm:$0xf] }
  0xc2   :  { %v397_v28 = vsel %vm395_vm5, %v332_v26, %v388_v24  ;;  %v137_v29 = vpop.permute.xlu2 %136  ;;  %v344_v3 = vsel %vm312_vm2, %v84_v19, %v1071_v27 }
  0xc3   :  { %406 = vst [vmem:[#allocation1 + $0x1] ss:$2 sm:$0xff] %v397_v28  ;;  %v422_v30 = vld.sshfl [vmem:[#allocation1 + $0x20] sm:$0xff pattern:$0x75316420]  ;;  %v317_v53 = vsel %vm312_vm2, %v51_v47, %v137_v29  ;;  %v352_v29 = vsel %vm321_vm3, %v344_v3, %v1059_v20 }
  0xc4   :  { %v423_v31 = vld.sshfl [vmem:[#allocation1 + $0x28] sm:$0xff pattern:$0x75316420] }
  0xc8   :  { %v233_v50 = vpop.permute.xlu0 %232 }
  0xc9   :  { %v265_v16 = vpop.permute.xlu1 %264  ;;  %v343_v49 = vsel %vm312_vm2, %v83_v44, %v233_v50 }
  0xca   :  { %v419_v32 = vld.sshfl [vmem:[#allocation1] sm:$0xff pattern:$0x75316420]  ;;  %v420_v33 = vld.sshfl [vmem:[#allocation1 + $0x8] sm:$0xff pattern:$0x75316420]  ;;  %v143_v21 = vpop.permute.xlu2 %142  ;;  %v351_v51 = vsel %vm321_vm3, %v343_v49, %v265_v16 }
  0xcb   :  { %v451_v34 = vpack.c.bf16 %v422_v30, %v419_v32  ;;  %v452_v35 = vpack.c.bf16 %v423_v31, %v420_v33  ;;  %v320_v8 = vsel %vm312_vm2, %v54_v0, %v143_v21 }
  0xcd   :  { %619 = vmatmul.bf16.vlgmr.msra.gmra.mxu0 %v451_v34  ;;  %638 = vmatmul.bf16.vlgmr.msra.gmra.mxu1 %v452_v35 }
  0xd0   :  { %v239_v13 = vpop.permute.xlu0 %238 }
  0xd1   :  { %v271_v36 = vpop.permute.xlu1 %270  ;;  %v346_v60 = vsel %vm312_vm2, %v86_v62, %v239_v13 }
  0xd2   :  { %v301_v37 = vpop.permute.xlu2 %300  ;;  %v354_v4 = vsel %vm321_vm3, %v346_v60, %v271_v36 }
  0xd8   :  { %v269_v38 = vpop.permute.xlu0 %268 }
  0xd9   :  { %v141_v39 = vpop.permute.xlu1 %140  ;;  %v353_v15 = vsel %vm321_vm3, %v345_v54, %v269_v38 }
  0xda   :  { %v171_v40 = vpop.permute.xlu2 %170  ;;  %v361_v22 = vsel %vm330_vm4, %v353_v15, %v301_v37  ;;  %v319_v6 = vsel %vm312_vm2, %v53_v18, %v141_v39  ;;  %v797_v37 = vld [vmem:[%s1118_s2] ss:$0 sm:$0xff]  ;;  %s828_s2 = smov [#allocation3]  }
  0xdb   :  { %v393_v2 = vrot.slane %v361_v22, 4  ;;  %s676_s12 = sshll.u32 %s828_s2, 4  ;;  %s677_s12 = int_to_ptr.vmem [resolvable:$true] %s676_s12 }
  0xe0   :  { %v139_v41 = vpop.permute.xlu0 %138 }
  0xe1   :  { %v299_v42 = vpop.permute.xlu1 %298  ;;  %v318_v50 = vsel %vm312_vm2, %v52_v25, %v139_v41 }
  0xe2   :  { %v201_v48 = vpop.permute.xlu2 %200  ;;  %v360_v30 = vsel %vm330_vm4, %v352_v29, %v299_v42  ;;  %v327_v31 = vsel %vm321_vm3, %v318_v50, %v171_v40 }
  0xe3   :  { %v392_v27 = vrot.slane %v360_v30, 4 }
  0xe8   :  { %v297_v52 = vpop.permute.xlu0 %296 }
  0xe9   :  { %v359_v55 = vsel %vm330_vm4, %v351_v51, %v297_v52  ;;  %v169_v56 = vpop.permute.xlu1 %168 }
  0xea   :  { %v391_v57 = vrot.slane %v359_v55, 4  ;;  %v326_v58 = vsel %vm321_vm3, %v317_v53, %v169_v56  ;;  %v207_v7 = vpop.permute.xlu2 %206 }
  0xeb   :  { %v335_v59 = vsel %vm330_vm4, %v326_v58, %v201_v48 }
  0xec   :  { %v400_v63 = vsel %vm395_vm5, %v335_v59, %v391_v57 }
  0xed   :  { %425 = vst [vmem:[#allocation1] ss:$2 sm:$0xff] %v400_v63 }
  0xf0   :  { %v303_v5 = vpop.permute.xlu0 %302 }
  0xf1   :  { %v362_v61 = vsel %vm330_vm4, %v354_v4, %v303_v5  ;;  %v175_v10 = vpop.permute.xlu1 %174 }
  0xf2   :  { %v394_v11 = vrot.slane %v362_v61, 4  ;;  %v329_v14 = vsel %vm321_vm3, %v320_v8, %v175_v10 }
  0xf3   :  { %v338_v9 = vsel %vm330_vm4, %v329_v14, %v207_v7 }
  0xf4   :  { %v403_v17 = vsel %vm395_vm5, %v338_v9, %v394_v11 }
  0xf5   :  { %430 = vst [vmem:[#allocation1 + $0x21] ss:$2 sm:$0xff] %v403_v17 }
  0xf8   :  { %v173_v12 = vpop.permute.xlu0 %172 }
  0xf9   :  { %v328_v23 = vsel %vm321_vm3, %v319_v6, %v173_v12  ;;  %v205_v24 = vpop.permute.xlu1 %204 }
  0xfa   :  { %v337_v26 = vsel %vm330_vm4, %v328_v23, %v205_v24 }
  0xfb   :  { %v402_v28 = vsel %vm395_vm5, %v337_v26, %v393_v2 }
  0xfc   :  { %429 = vst [vmem:[#allocation1 + $0x20] ss:$2 sm:$0xff] %v402_v28 }
 0x100   :  { %v203_v16 = vpop.permute.xlu0 %202 }
 0x101   :  { %v336_v32 = vsel %vm330_vm4, %v327_v31, %v203_v16 }
 0x102   :  { %v401_v33 = vsel %vm395_vm5, %v336_v32, %v392_v27 }
 0x103   :  { %426 = vst [vmem:[#allocation1 + $0x1] ss:$2 sm:$0xff] %v401_v33  ;;  %v436_v21 = vld.sshfl [vmem:[#allocation1 + $0x20] sm:$0xff pattern:$0x75316420] }
 0x104   :  { %v437_v34 = vld.sshfl [vmem:[#allocation1 + $0x28] sm:$0xff pattern:$0x75316420]  ;;  %v658_v38 = vpop.f32.mrf.mxu2 }
 0x10a   :  { %v433_v35 = vld.sshfl [vmem:[#allocation1] sm:$0xff pattern:$0x75316420]  ;;  %v434_v13 = vld.sshfl [vmem:[#allocation1 + $0x8] sm:$0xff pattern:$0x75316420] }
 0x10b   :  { %v454_v36 = vpack.c.bf16 %v436_v21, %v433_v35  ;;  %v455_v20 = vpack.c.bf16 %v437_v34, %v434_v13 }
 0x10c   :  { %v660_v47 = vpop.f32.mrf.mxu2 }
 0x10d   :  { %624 = vmatmul.bf16.vlgmr.msra.gmra.mxu3 %v454_v36  ;;  %643 = vmatmul.bf16.gmra.mxu1 %v455_v20 }
 0x139   :  { %v663_v55 = vpop.f32.mrf.mxu2 }
 0x141   :  { %v665_v0 = vpop.f32.mrf.mxu2 }
 0x14a   :  { %v620_v39 = vpop.f32.mrf.mxu0  ;;  %v639_v40 = vpop.f32.mrf.mxu1 }
 0x14b   :  { %v621_v41 = vadd.f32 %v797_v37, %v620_v39 }
 0x14d   :  { %v640_v42 = vadd.f32 %v639_v40, %v621_v41 }
 0x14f   :  { %v659_v43 = vadd.f32 %v658_v38, %v640_v42 }
 0x151   :  { %668 = vst.msk [vmem:[#allocation3] sm:$0xff] %vm312_vm2, %v659_v43 }
 0x152   :  { %v622_v44 = vpop.f32.mrf.mxu0  ;;  %v641_v46 = vpop.f32.mrf.mxu1 }
 0x153   :  { %v623_v45 = vadd.f32 %v797_v37, %v622_v44 }
 0x155   :  { %v642_v48 = vadd.f32 %v641_v46, %v623_v45 }
 0x157   :  { %v661_v49 = vadd.f32 %v660_v47, %v642_v48 }
 0x159   :  { %669 = vst.msk [vmem:[#allocation3 + $0x8] sm:$0xff] %vm312_vm2, %v661_v49 }
 0x18a   :  { %v644_v51 = vpop.f32.mrf.mxu1 }
 0x190   :  { %v625_v52 = vpop.f32.mrf.mxu3 }
 0x191   :  { %v626_v53 = vadd.f32 %v797_v37, %v625_v52 }
 0x192   :  { %v646_v62 = vpop.f32.mrf.mxu1 }
 0x193   :  { %v645_v56 = vadd.f32 %v644_v51, %v626_v53 }
 0x195   :  { %v664_v57 = vadd.f32 %v663_v55, %v645_v56 }
 0x197   :  { %670 = vst.msk [vmem:[#allocation3 + $0x10] sm:$0xff] %vm312_vm2, %v664_v57 }
 0x198   :  { %v627_v58 = vpop.f32.mrf.mxu3 }
 0x199   :  { %v628_v59 = vadd.f32 %v797_v37, %v627_v58 }
 0x19b   :  { %v647_v63 = vadd.f32 %v646_v62, %v628_v59 }
 0x19d   :  { %v666_v1 = vadd.f32 %v665_v0, %v647_v63 }
 0x19f   :  { %671 = vst.msk [vmem:[#allocation3 + $0x18] sm:$0xff] %vm312_vm2, %v666_v1 }
 0x1a0   :  { %684 = dma.vmem_to_hbm [thread:$0]  %s677_s12, 512, %s679_s15, [#allocation4], %s829_s16, %s829_s16, %s830_s17  }
 0x1a1   :  { %822 = dma.done.wait [#allocation4], 512  }
 0x1a2   :  { %823 = vsyncadd [#allocation4], 4294966784 }
 0x1a3   :  { %689 = vsyncpa [#allocation4], 1 }

</bundles_post_ra>
